<compile_context>
chip_gen: v7x
topology: tpu7x:2x2x1
jax: 0.10.0
libtpu: 0.0.40
codegen_flags: <defaults>
</compile_context>

<pallas_src>
import jax
import jax.numpy as jnp
from jax.experimental import pallas as pl
from jax.experimental.pallas import tpu as pltpu

_LANE = 128      # lane width (last dim)
_SUBLANE = 8     # sublane width (second-to-last dim)


def _round_up(x: int, m: int) -> int:
    return ((x + m - 1) // m) * m


def _mlp_kernel(x_ref, w1_ref, b1_ref, w2_ref, b2_ref, o_ref):
    # x: [TB, F], w1: [F, Hp], b1: [1, Hp], w2: [Hp, C], b2: [1, C], o: [TB, C]
    x = x_ref[...]
    h = jnp.dot(x, w1_ref[...], preferred_element_type=jnp.float32) + b1_ref[...]
    h = jnp.maximum(h, 0.0)  # ReLU (zero-padded hidden cols stay exactly 0)
    out = jnp.dot(h, w2_ref[...], preferred_element_type=jnp.float32) + b2_ref[...]
    o_ref[...] = out.astype(o_ref.dtype)


def _choose_batch_tile(B: int, block_b: int) -> int:
    """Pick TB: as large as possible (amortize per-step overhead, long DMAs) while
    keeping >= 2 grid steps when the batch allows it (v7x megacore sharding)."""
    if B <= _SUBLANE:
        return B  # block equals full batch dim -> always legal
    tb = _round_up(pl.cdiv(B, 2), _SUBLANE)  # aim for >= 2 grid steps
    return min(tb, block_b)


def _estimate_vmem_bytes(TB: int, F: int, Hp: int, C: int, itemsize: int = 4) -> int:
    """Rough double-buffered VMEM footprint (last dim lane-padded in VMEM)."""
    lane = lambda d: _round_up(d, _LANE)
    x_blk = TB * lane(F) * itemsize
    o_blk = TB * lane(C) * itemsize
    w1_blk = _round_up(F, _SUBLANE) * Hp * itemsize
    w2_blk = Hp * lane(C) * itemsize
    b_blk = _SUBLANE * (Hp + lane(C)) * itemsize
    return 2 * (x_blk + o_blk + w1_blk + w2_blk + b_blk)


def classifier_forward(features, w1, b1, w2, b2, *, block_b: int = 2048):
    """features: [B, F]; w1: [F, H]; b1: [H]; w2: [H, C]; b2: [C] -> [B, C]."""
    B, F = features.shape
    H = w1.shape[1]
    C = w2.shape[1]

    # --- pad only the hidden dim of the weights (zero padding => identical math) ---
    Hp = _round_up(H, _LANE)
    w1p = jnp.pad(w1, ((0, 0), (0, Hp - H)))
    b1p = jnp.pad(b1, (0, Hp - H)).reshape(1, Hp)
    w2p = jnp.pad(w2, ((0, Hp - H), (0, 0)))
    b2p = b2.reshape(1, C)

    # --- batch tiling: TB rows per grid step, weights resident across steps ---
    TB = _choose_batch_tile(B, block_b)
    grid = (pl.cdiv(B, TB),)

    itemsize = jnp.dtype(features.dtype).itemsize
    flops = 2 * B * (F * H + H * C)
    bytes_accessed = (B * F + F * Hp + Hp + Hp * C + C + B * C) * itemsize

    vmem_limit = min(max(2 * _estimate_vmem_bytes(TB, F, Hp, C), 32 << 20), 64 << 20)

    out = pl.pallas_call(
        _mlp_kernel,
        out_shape=jax.ShapeDtypeStruct((B, C), features.dtype),
        grid=grid,
        in_specs=[
            pl.BlockSpec((TB, F), lambda i: (i, 0)),    # x: streamed along batch
            pl.BlockSpec((F, Hp), lambda i: (0, 0)),    # w1: resident
            pl.BlockSpec((1, Hp), lambda i: (0, 0)),    # b1: resident
            pl.BlockSpec((Hp, C), lambda i: (0, 0)),    # w2: resident
            pl.BlockSpec((1, C), lambda i: (0, 0)),     # b2: resident
        ],
        out_specs=pl.BlockSpec((TB, C), lambda i: (i, 0)),  # unpadded output
        compiler_params=pltpu.CompilerParams(
            dimension_semantics=("parallel",),
            vmem_limit_bytes=vmem_limit,
        ),
        cost_estimate=pl.CostEstimate(
            flops=flops, transcendentals=0, bytes_accessed=bytes_accessed,
        ),
    )(features, w1p, b1p, w2p, b2p)

    return out


def init_params(key, num_features, num_classes, num_inter_features=7, dtype=jnp.float32):
    """Deterministic init mimicking PyTorch's default Linear init (uniform ±1/sqrt(fan_in))."""
    k1, k2, k3, k4 = jax.random.split(key, 4)
    bound1 = 1.0 / jnp.sqrt(num_features)
    bound2 = 1.0 / jnp.sqrt(num_inter_features)
    # Stored as [in, out] (transpose of PyTorch's [out, in]) so the kernel does x @ W.
    w1 = jax.random.uniform(k1, (num_features, num_inter_features), dtype, -bound1, bound1)
    b1 = jax.random.uniform(k2, (num_inter_features,), dtype, -bound1, bound1)
    w2 = jax.random.uniform(k3, (num_inter_features, num_classes), dtype, -bound2, bound2)
    b2 = jax.random.uniform(k4, (num_classes,), dtype, -bound2, bound2)
    return w1, b1, w2, b2


if __name__ == "__main__":
    num_features = 32
    num_classes = 10
    num_inter_features = 7
    batch = 8

    key = jax.random.PRNGKey(0)
    kx, kp = jax.random.split(key)
    features = jax.random.normal(kx, (batch, num_features), jnp.float32)
    w1, b1, w2, b2 = init_params(kp, num_features, num_classes, num_inter_features)

    preds = classifier_forward(features, w1, b1, w2, b2)
    preds = jax.block_until_ready(preds)

    # Pure-JAX reference check of the same forward math.
    ref = jnp.maximum(features @ w1 + b1, 0.0) @ w2 + b2
    assert preds.shape == (batch, num_classes)
    assert jnp.allclose(preds, ref, atol=1e-5, rtol=1e-5)

    # Also exercise a ragged batch (B not a multiple of the tile) to cover the
    # cdiv grid / masked-final-block path.
    feats2 = jax.random.normal(kx, (batch + 5, num_features), jnp.float32)
    preds2 = jax.block_until_ready(classifier_forward(feats2, w1, b1, w2, b2))
    ref2 = jnp.maximum(feats2 @ w1 + b1, 0.0) @ w2 + b2
    assert preds2.shape == (batch + 5, num_classes)
    assert jnp.allclose(preds2, ref2, atol=1e-5, rtol=1e-5)

    print("KERNEL_OK")
</pallas_src>

<mosaic_0001>
module attributes {stable_mosaic.version = 11 : i64} {
  func.func @_mlp_kernel(%arg0: i32, %arg1: memref<8x32xf32, #tpu.memory_space<vmem>>, %arg2: memref<32x128xf32, #tpu.memory_space<vmem>>, %arg3: memref<1x128xf32, #tpu.memory_space<vmem>>, %arg4: memref<128x10xf32, #tpu.memory_space<vmem>>, %arg5: memref<1x10xf32, #tpu.memory_space<vmem>>, %arg6: memref<8x10xf32, #tpu.memory_space<vmem>>) attributes {dimension_semantics = [#tpu.dimension_semantics<parallel>], iteration_bounds = array<i64: 1>, scalar_prefetch = 0 : i64, scratch_operands = 0 : i64, tpu.core_type = #tpu.core_type<tc>, window_params = [{transform_indices = @transform_0, window_bounds = array<i64: 8, 32>}, {pipeline_mode = #tpu.pipeline_mode<synchronous>, transform_indices = @transform_1, window_bounds = array<i64: 32, 128>}, {pipeline_mode = #tpu.pipeline_mode<synchronous>, transform_indices = @transform_2, window_bounds = array<i64: 1, 128>}, {pipeline_mode = #tpu.pipeline_mode<synchronous>, transform_indices = @transform_3, window_bounds = array<i64: 128, 10>}, {pipeline_mode = #tpu.pipeline_mode<synchronous>, transform_indices = @transform_4, window_bounds = array<i64: 1, 10>}, {transform_indices = @transform_5, window_bounds = array<i64: 8, 10>}]} {
    %c0 = arith.constant 0 : index
    %c0_0 = arith.constant 0 : index
    %0 = vector.load %arg1[%c0, %c0_0] : memref<8x32xf32, #tpu.memory_space<vmem>>, vector<8x32xf32>
    %c0_1 = arith.constant 0 : index
    %c0_2 = arith.constant 0 : index
    %1 = vector.load %arg2[%c0_1, %c0_2] : memref<32x128xf32, #tpu.memory_space<vmem>>, vector<32x128xf32>
    %cst = arith.constant dense<0.000000e+00> : vector<8x128xf32>
    %2 = tpu.matmul %0, %1, %cst {dimension_numbers = #tpu.dot_dimension_numbers<[1], [0], [0], [1], [0, 0, 1, 1], [], []>} : vector<8x32xf32>, vector<32x128xf32>, vector<8x128xf32> -> vector<8x128xf32>
    %c0_3 = arith.constant 0 : index
    %c0_4 = arith.constant 0 : index
    %3 = vector.load %arg3[%c0_3, %c0_4] : memref<1x128xf32, #tpu.memory_space<vmem>>, vector<1x128xf32>
    %4 = vector.broadcast %3 : vector<1x128xf32> to vector<8x128xf32>
    %5 = arith.addf %2, %4 : vector<8x128xf32>
    %cst_5 = arith.constant 0.000000e+00 : f32
    %6 = vector.broadcast %cst_5 : f32 to vector<8x128xf32>
    %7 = arith.maximumf %5, %6 : vector<8x128xf32>
    %c0_6 = arith.constant 0 : index
    %c0_7 = arith.constant 0 : index
    %8 = vector.load %arg4[%c0_6, %c0_7] : memref<128x10xf32, #tpu.memory_space<vmem>>, vector<128x10xf32>
    %cst_8 = arith.constant dense<0.000000e+00> : vector<8x10xf32>
    %9 = tpu.matmul %7, %8, %cst_8 {dimension_numbers = #tpu.dot_dimension_numbers<[1], [0], [0], [1], [0, 0, 1, 1], [], []>} : vector<8x128xf32>, vector<128x10xf32>, vector<8x10xf32> -> vector<8x10xf32>
    %c0_9 = arith.constant 0 : index
    %c0_10 = arith.constant 0 : index
    %10 = vector.load %arg5[%c0_9, %c0_10] : memref<1x10xf32, #tpu.memory_space<vmem>>, vector<1x10xf32>
    %11 = vector.broadcast %10 : vector<1x10xf32> to vector<8x10xf32>
    %12 = arith.addf %9, %11 : vector<8x10xf32>
    %c0_11 = arith.constant 0 : index
    %c0_12 = arith.constant 0 : index
    %13 = vector.load %arg6[%c0_11, %c0_12] : memref<8x10xf32, #tpu.memory_space<vmem>>, vector<8x10xf32>
    tpu.vector_store %arg6[%c0_11, %c0_12], %12 {strides = array<i32>} : memref<8x10xf32, #tpu.memory_space<vmem>>, vector<8x10xf32>,
    return
  }
  func.func @transform_0(%arg0: i32) -> (i32, i32) {
    %c0_i32 = arith.constant 0 : i32
    %c0_i32_0 = arith.constant 0 : i32
    return %arg0, %c0_i32 : i32, i32
  }
  func.func @transform_1(%arg0: i32) -> (i32, i32) {
    %c0_i32 = arith.constant 0 : i32
    %c0_i32_0 = arith.constant 0 : i32
    %c0_i32_1 = arith.constant 0 : i32
    return %c0_i32, %c0_i32_0 : i32, i32
  }
  func.func @transform_2(%arg0: i32) -> (i32, i32) {
    %c0_i32 = arith.constant 0 : i32
    %c0_i32_0 = arith.constant 0 : i32
    %c0_i32_1 = arith.constant 0 : i32
    return %c0_i32, %c0_i32_0 : i32, i32
  }
  func.func @transform_3(%arg0: i32) -> (i32, i32) {
    %c0_i32 = arith.constant 0 : i32
    %c0_i32_0 = arith.constant 0 : i32
    %c0_i32_1 = arith.constant 0 : i32
    return %c0_i32, %c0_i32_0 : i32, i32
  }
  func.func @transform_4(%arg0: i32) -> (i32, i32) {
    %c0_i32 = arith.constant 0 : i32
    %c0_i32_0 = arith.constant 0 : i32
    %c0_i32_1 = arith.constant 0 : i32
    return %c0_i32, %c0_i32_0 : i32, i32
  }
  func.func @transform_5(%arg0: i32) -> (i32, i32) {
    %c0_i32 = arith.constant 0 : i32
    %c0_i32_0 = arith.constant 0 : i32
    return %arg0, %c0_i32 : i32, i32
  }
}

</mosaic_0001>

<bundles_post_ra>
// kernel: tpu_custom_call.1
= control target key start
LH: loop header
LB: loop body
LE: loop exit
PB: predicated region body
PF: predicated region fallthrough
CT: control target
= control target key end

     0   :  { %v346_v3 = vmov 0.0|0.0   ;;  %vm347_vm0 = vmmov 0   ;;  %v348_v6 = vmov 0.0   ;;  %s461_s0 = inlined_call_operand.vmem [shape: f32[8,32], index: 0, kind: input, shape index: {}]   ;;  %s462_s1 = inlined_call_operand.vmem [shape: f32[32,128], index: 1, kind: input, shape index: {}]   ;;  %s463_s2 = inlined_call_operand.vmem [shape: f32[1,128], index: 2, kind: input, shape index: {}]   ;;  %s464_s3 = inlined_call_operand.vmem [shape: f32[128,10], index: 3, kind: input, shape index: {}]   ;;  %s465_s4 = inlined_call_operand.vmem [shape: f32[1,10], index: 4, kind: input, shape index: {}]   ;;  %s466_s5 = inlined_call_operand.hbm [shape: f32[8,10], index: 5, kind: output, shape index: {}]  }
   0x1   :  { %v22_v0 = vld [vmem:[%s462_s1] sm:$0xff]  ;;  %v23_v1 = vld [vmem:[%s462_s1 + $0x8] sm:$0xff]  ;;  %v24_v2 = vld [vmem:[%s462_s1 + $0x10] sm:$0xff]  ;;  %288 = vmatprep.subr.bf16.mxu0 %v346_v3  ;;  %250 = vmatprep.mubr.msk.f32.mxu0 %vm347_vm0, %v348_v6 }
   0x2   :  { %v289_v4 = vpack.c.bf16 %v23_v1, %v22_v0  ;;  %v25_v5 = vld [vmem:[%s462_s1 + $0x18] sm:$0xff]  ;;  %v108_v7 = vld [vmem:[%s464_s3] sm:$0xff]  ;;  %294 = vmatprep.subr.bf16.mxu1 %v346_v3  ;;  %v109_v8 = vld [vmem:[%s464_s3 + $0x8] sm:$0xff]  ;;  %285 = vmatprep.mubr.msk.f32.mxu1 %vm347_vm0, %v348_v6 }
   0x3   :  { %v110_v9 = vld [vmem:[%s464_s3 + $0x10] sm:$0xff]  ;;  %v111_v10 = vld [vmem:[%s464_s3 + $0x18] sm:$0xff]  ;;  %v292_v11 = vpack.c.bf16 %v25_v5, %v24_v2  ;;  %v295_v12 = vpack.c.bf16 %v109_v8, %v108_v7  ;;  %v112_v14 = vld [vmem:[%s464_s3 + $0x20] sm:$0xff] }
   0x4   :  { %290 = vmatpush3.bf16.msra.mxu0 %v289_v4  ;;  %v298_v13 = vpack.c.bf16 %v111_v10, %v110_v9  ;;  %v113_v15 = vld [vmem:[%s464_s3 + $0x28] sm:$0xff] }
   0x5   :  { %291 = vmatprep.subr.bf16.mxu0 %v346_v3  ;;  %296 = vmatpush3.bf16.msra.mxu1 %v295_v12 }
   0x6   :  { %297 = vmatprep.subr.bf16.mxu1 %v346_v3 }
   0x7   :  { %10 = vsyncpa [#allocation3], 0  ;;  %v21_v16 = vld [vmem:[%s461_s0] sm:$0xff]  ;;  %vm33_vm1 = vcmask 261120   ;;  %v301_v17 = vpack.c.bf16 %v113_v15, %v112_v14  ;;  %v114_v18 = vld [vmem:[%s464_s3 + $0x30] sm:$0xff]  ;;  %s349_s11 = smov [#allocation2]  }
   0x8   :  { %293 = vmatpush3.bf16.msra.mxu0 %v292_v11  ;;  %v115_v19 = vld [vmem:[%s464_s3 + $0x38] sm:$0xff]  ;;  %v116_v21 = vld [vmem:[%s464_s3 + $0x40] sm:$0xff]  ;;  %v117_v22 = vld [vmem:[%s464_s3 + $0x48] sm:$0xff]  ;;  %s209_s12 = sshll.u32 %s349_s11, 4  ;;  %vm201_vm2 = vcmask 80896   ;;  %s210_s12 = int_to_ptr.vmem [resolvable:$true] %s209_s12 }
   0x9   :  { %299 = vmatpush3.bf16.msra.mxu1 %v298_v13  ;;  %v304_v20 = vpack.c.bf16 %v115_v19, %v114_v18  ;;  %v307_v23 = vpack.c.bf16 %v117_v22, %v116_v21  ;;  %v118_v24 = vld [vmem:[%s464_s3 + $0x50] sm:$0xff]  ;;  %v119_v25 = vld [vmem:[%s464_s3 + $0x58] sm:$0xff]  ;;  %v120_v27 = vld [vmem:[%s464_s3 + $0x60] sm:$0xff]  ;;  %p327_p1 = scmp.lt.s32.totalorder %s210_s12, %s210_s12 }
   0xa   :  { %300 = vmatprep.subr.bf16.mxu1 %v346_v3  ;;  %v310_v26 = vpack.c.bf16 %v119_v25, %v118_v24  ;;  %v121_v28 = vld [vmem:[%s464_s3 + $0x68] sm:$0xff]  ;;  %v122_v30 = vld [vmem:[%s464_s3 + $0x70] sm:$0xff]  ;;  %v123_v31 = vld [vmem:[%s464_s3 + $0x78] sm:$0xff]  ;;  %s322_s3 = scalar_lea.vmem %s210_s12, 128 }
   0xb   :  { %251 = vmatmul.mubr.msk.f32.vlgmr.msra.gmra.mrb[0].mxu0 %vm33_vm1, %v21_v16  ;;  %v313_v29 = vpack.c.bf16 %v121_v28, %v120_v27  ;;  %v316_v32 = vpack.c.bf16 %v123_v31, %v122_v30  ;;  %v217_v33 = vld [vmem:[%s463_s2] ss:$0 sm:$0xff]  ;;  %p323_p0 = scmp.ne.s32.totalorder %s210_s12, %s322_s3  ;;  %p328_p2 = scmp.lt.s32.totalorder %s322_s3, %s322_s3 }
   0xc   :  { %v219_v38 = vld [vmem:[%s465_s4] ss:$0 sm:$0xff] }
   0xd   :  { %302 = vmatpush3.bf16.msra.mxu1 %v301_v17  ;;  %p329_p3 = por %p328_p2, %p327_p1 }
   0xe   :  { %303 = vmatprep.subr.bf16.mxu1 %v346_v3 }
   0xf   :  { %p330_p4 = pnand %p329_p3, %p323_p0 }
  0x11   :  { %305 = vmatpush3.bf16.msra.mxu1 %v304_v20 }
  0x12   :  { %306 = vmatprep.subr.bf16.mxu1 %v346_v3 }
  0x15   :  { %308 = vmatpush3.bf16.msra.mxu1 %v307_v23 }
  0x16   :  { %309 = vmatprep.subr.bf16.mxu1 %v346_v3 }
  0x19   :  { %311 = vmatpush3.bf16.msra.mxu1 %v310_v26 }
  0x1a   :  { %312 = vmatprep.subr.bf16.mxu1 %v346_v3 }
  0x1d   :  { %314 = vmatpush3.bf16.msra.mxu1 %v313_v29 }
  0x1e   :  { %315 = vmatprep.subr.bf16.mxu1 %v346_v3 }
  0x21   :  { %317 = vmatpush3.bf16.msra.mxu1 %v316_v32 }
  0xde   :  { %v103_v34 = vpop.f32.mrb[0].mxu0 }
  0xdf   :  { %v104_v35 = vadd.f32 %v217_v33, %v103_v34  ;;  %v252_v36 = vpop.f32.mrb[1].mxu0 }
  0xe1   :  { %v107_v37 = vmax.f32 %v104_v35, 0.0 }
  0xe3   :  { %286 = vmatmul.mubr.f32.vlgmr.msra.gmra.mrb[0].mxu1 %v107_v37 }
 0x1b6   :  { %v197_v39 = vpop.f32.mrb[0].mxu1 }
 0x1b7   :  { %v198_v40 = vadd.f32 %v219_v38, %v197_v39  ;;  %v287_v41 = vpop.f32.mrb[1].mxu1 }
 0x1b9   :  { %202 = vst.msk [vmem:[#allocation2] sm:$0xff] %vm201_vm2, %v198_v40 }
 0x1ba   :  { %333 = shalt.err (!%p330_p4)
}
 0x1bb   :  { %s334_s14 = scalar_lea.hbm %s466_s5, 128 }
 0x1bc   :  { %p335_p5 = scmp.ne.s32.totalorder %s466_s5, %s334_s14  ;;  %p338_p6 = scmp.lt.u32.totalorder %s334_s14, %s466_s5 }
 0x1be   :  { %p340_p7 = pnand %p338_p6, %p335_p5 }
 0x1c0   :  { %343 = shalt.err (!%p340_p7)
}
 0x1c1   :  { %212 = dma.vmem_to_hbm [thread:$0]  %s210_s12, 128, %s466_s5, [#allocation3]  }
 0x1c2   :  { %344 = dma.done.wait [#allocation3], 128  }
 0x1c3   :  { %345 = vsyncadd [#allocation3], 4294967168 }
 0x1c4   :  { %216 = vsyncpa [#allocation3], 1 }

</bundles_post_ra>
